<compile_context>
chip_gen: v7x
topology: tpu7x:2x2x1
jax: 0.10.0
libtpu: 0.0.40
codegen_flags: <defaults>
</compile_context>

<pallas_src>
import functools
import math

import jax
import jax.numpy as jnp
from jax.experimental import pallas as pl
from jax.experimental.pallas import tpu as pltpu

# 48 MiB: explicit (v5e default scoped VMEM is only 16 MiB) yet below v7x's 64 MiB/TC.
_VMEM_LIMIT = 48 * 1024 * 1024


def _round_up(x, m):
    return (x + m - 1) // m * m


def _pick_tile(dim, max_tile, align):
    """Pick a tile that is a multiple of `align`, <= max_tile and — whenever
    possible — divides the aligned dimension exactly, so no padding and no
    extra MXU/DMA work is introduced.  Returns (tile, padded_dim)."""
    dp = _round_up(dim, align)
    if dp <= max_tile:
        return dp, dp
    t = (max_tile // align) * align
    while t >= align:
        if dp % t == 0 and t * 4 >= max_tile:
            return t, dp
        t -= align
    t = (max_tile // align) * align
    return t, _round_up(dp, t)


# -----------------------------------------------------------------------------
# Tiled matmul: y = act(x @ W + b), bf16 operands, f32 accumulation
# -----------------------------------------------------------------------------
def _matmul_kernel(x_ref, w_ref, b_ref, o_ref, acc_ref, *, activation):
    @pl.when(pl.program_id(2) == 0)
    def _():
        acc_ref[...] = jnp.zeros_like(acc_ref)

    acc_ref[...] += jnp.dot(x_ref[...], w_ref[...],
                            preferred_element_type=jnp.float32)

    @pl.when(pl.program_id(2) == pl.num_programs(2) - 1)
    def _():
        y = acc_ref[...] + b_ref[...]
        if activation == "gelu":
            # tanh-approximate GELU; transcendental stays on the EUP.
            # TODO(synk): PyTorch nn.GELU default is the exact erf form.
            c = math.sqrt(2.0 / math.pi)
            y = 0.5 * y * (1.0 + jnp.tanh(c * (y + 0.044715 * y * y * y)))
        elif activation == "tanh":
            y = jnp.tanh(y)
        o_ref[...] = y.astype(o_ref.dtype)


def linear(x, w, b, activation="none", out_dtype=jnp.bfloat16,
           tm_max=1024, tn_max=768, tk_max=1024):
    M, K = x.shape
    N = w.shape[1]
    tm, Mp = _pick_tile(M, tm_max, 8)
    tn, Np = _pick_tile(N, tn_max, 128)
    tk, Kp = _pick_tile(K, tk_max, 128)

    xb = x.astype(jnp.bfloat16)
    wb = w.astype(jnp.bfloat16)
    bb = b.astype(jnp.float32).reshape(1, N)
    if (Mp, Kp) != (M, K):
        xb = jnp.pad(xb, ((0, Mp - M), (0, Kp - K)))
    if (Kp, Np) != (K, N):
        wb = jnp.pad(wb, ((0, Kp - K), (0, Np - N)))
    if Np != N:
        bb = jnp.pad(bb, ((0, 0), (0, Np - N)))

    out = pl.pallas_call(
        functools.partial(_matmul_kernel, activation=activation),
        out_shape=jax.ShapeDtypeStruct((Mp, Np), out_dtype),
        grid=(Mp // tm, Np // tn, Kp // tk),
        in_specs=[
            pl.BlockSpec((tm, tk), lambda i, j, k: (i, k)),
            pl.BlockSpec((tk, tn), lambda i, j, k: (k, j)),
            pl.BlockSpec((1, tn), lambda i, j, k: (0, j)),
        ],
        out_specs=pl.BlockSpec((tm, tn), lambda i, j, k: (i, j)),
        scratch_shapes=[pltpu.VMEM((tm, tn), jnp.float32)],
        compiler_params=pltpu.CompilerParams(
            dimension_semantics=("parallel", "parallel", "arbitrary"),
            vmem_limit_bytes=_VMEM_LIMIT),
    )(xb, wb, bb)
    if (Mp, Np) != (M, N):
        out = out[:M, :N]
    return out


# -----------------------------------------------------------------------------
# Matmul with fused residual-add + LayerNorm epilogue (tn == N, full row in tile)
# -----------------------------------------------------------------------------
def _matmul_res_ln_kernel(x_ref, w_ref, b_ref, r_ref, g_ref, beta_ref,
                          o_ref, acc_ref, *, eps):
    @pl.when(pl.program_id(1) == 0)
    def _():
        acc_ref[...] = jnp.zeros_like(acc_ref)

    acc_ref[...] += jnp.dot(x_ref[...], w_ref[...],
                            preferred_element_type=jnp.float32)

    @pl.when(pl.program_id(1) == pl.num_programs(1) - 1)
    def _():
        z = acc_ref[...] + b_ref[...] + r_ref[...].astype(jnp.float32)
        mu = jnp.mean(z, axis=-1, keepdims=True)
        var = jnp.maximum(jnp.mean(z * z, axis=-1, keepdims=True) - mu * mu, 0.0)
        zn = (z - mu) * jax.lax.rsqrt(var + eps)
        o_ref[...] = (zn * g_ref[...] + beta_ref[...]).astype(o_ref.dtype)


def linear_residual_layernorm(x, w, b, residual, gamma, beta, eps=1e-12,
                              out_dtype=jnp.bfloat16, tm_max=1024, tk_max=1024,
                              tn_fuse_max=1024):
    """y = LayerNorm(x @ W + b + residual) with the LN fused into the matmul
    epilogue when the output width is lane-aligned; otherwise falls back to
    linear() + layer_norm(residual=...)."""
    M, K = x.shape
    N = w.shape[1]
    if N % 128 != 0 or N > tn_fuse_max:
        y = linear(x, w, b, out_dtype=out_dtype)
        return layer_norm(y, gamma, beta, residual=residual, eps=eps,
                          out_dtype=out_dtype)

    tm, Mp = _pick_tile(M, tm_max, 8)
    tk, Kp = _pick_tile(K, tk_max, 128)

    xb = x.astype(jnp.bfloat16)
    wb = w.astype(jnp.bfloat16)
    rb = residual.astype(jnp.bfloat16)
    bb = b.astype(jnp.float32).reshape(1, N)
    gg = gamma.astype(jnp.float32).reshape(1, N)
    be = beta.astype(jnp.float32).reshape(1, N)
    if (Mp, Kp) != (M, K):
        xb = jnp.pad(xb, ((0, Mp - M), (0, Kp - K)))
    if Kp != K:
        wb = jnp.pad(wb, ((0, Kp - K), (0, 0)))
    if Mp != M:
        rb = jnp.pad(rb, ((0, Mp - M), (0, 0)))

    out = pl.pallas_call(
        functools.partial(_matmul_res_ln_kernel, eps=eps),
        out_shape=jax.ShapeDtypeStruct((Mp, N), out_dtype),
        grid=(Mp // tm, Kp // tk),
        in_specs=[
            pl.BlockSpec((tm, tk), lambda i, k: (i, k)),
            pl.BlockSpec((tk, N), lambda i, k: (k, 0)),
            pl.BlockSpec((1, N), lambda i, k: (0, 0)),
            pl.BlockSpec((tm, N), lambda i, k: (i, 0)),
            pl.BlockSpec((1, N), lambda i, k: (0, 0)),
            pl.BlockSpec((1, N), lambda i, k: (0, 0)),
        ],
        out_specs=pl.BlockSpec((tm, N), lambda i, k: (i, 0)),
        scratch_shapes=[pltpu.VMEM((tm, N), jnp.float32)],
        compiler_params=pltpu.CompilerParams(
            dimension_semantics=("parallel", "arbitrary"),
            vmem_limit_bytes=_VMEM_LIMIT),
    )(xb, wb, bb, rb, gg, be)
    return out[:M] if Mp != M else out


# -----------------------------------------------------------------------------
# Row-tiled LayerNorm (optionally with fused residual add), one-pass variance
# -----------------------------------------------------------------------------
def _ln_math(x, g, b, eps):
    mu = jnp.mean(x, axis=-1, keepdims=True)
    var = jnp.maximum(jnp.mean(x * x, axis=-1, keepdims=True) - mu * mu, 0.0)
    return (x - mu) * jax.lax.rsqrt(var + eps) * g + b


def _ln_kernel(x_ref, g_ref, b_ref, o_ref, *, eps):
    x = x_ref[...].astype(jnp.float32)
    o_ref[...] = _ln_math(x, g_ref[...], b_ref[...], eps).astype(o_ref.dtype)


def _ln_residual_kernel(x_ref, r_ref, g_ref, b_ref, o_ref, *, eps):
    x = x_ref[...].astype(jnp.float32) + r_ref[...].astype(jnp.float32)
    o_ref[...] = _ln_math(x, g_ref[...], b_ref[...], eps).astype(o_ref.dtype)


def layer_norm(x, g, b, residual=None, eps=1e-12, out_dtype=jnp.bfloat16,
               tm_max=1024):
    M, H = x.shape
    tm = min(tm_max, _round_up(M, 8))
    Mp = _round_up(M, tm)

    def pad_rows(t):
        return t if Mp == M else jnp.pad(t, ((0, Mp - M), (0, 0)))

    row_spec = pl.BlockSpec((tm, H), lambda i: (i, 0))
    vec_spec = pl.BlockSpec((1, H), lambda i: (0, 0))

    args = [pad_rows(x)]
    in_specs = [row_spec]
    if residual is not None:
        args.append(pad_rows(residual))
        in_specs.append(row_spec)
        kernel = functools.partial(_ln_residual_kernel, eps=eps)
    else:
        kernel = functools.partial(_ln_kernel, eps=eps)
    args += [g.astype(jnp.float32).reshape(1, H),
             b.astype(jnp.float32).reshape(1, H)]
    in_specs += [vec_spec, vec_spec]

    out = pl.pallas_call(
        kernel,
        out_shape=jax.ShapeDtypeStruct((Mp, H), out_dtype),
        grid=(Mp // tm,),
        in_specs=in_specs,
        out_specs=row_spec,
        compiler_params=pltpu.CompilerParams(
            dimension_semantics=("parallel",),
            vmem_limit_bytes=_VMEM_LIMIT),
    )(*args)
    return out[:M] if Mp != M else out


# -----------------------------------------------------------------------------
# Multi-head attention over a fused [B*S, 3H] QKV array
# -----------------------------------------------------------------------------
def _pick_head_block(num_heads, head_dim):
    """Largest head group whose lane width is a multiple of 128 and <= 512
    (else the smallest 128-aligned group); None if no aligned group exists."""
    cands = [d for d in range(1, num_heads + 1)
             if num_heads % d == 0 and (d * head_dim) % 128 == 0]
    if not cands:
        return None
    small = [d for d in cands if d * head_dim <= 512]
    return max(small) if small else min(cands)


def _attention_kernel(q_ref, k_ref, v_ref, m_ref, o_ref, *, heads, head_dim, scale):
    mask = m_ref[0]                               # (1, S) additive mask, f32
    for h in range(heads):                        # unrolled over the head group
        lo = h * head_dim
        q = q_ref[:, lo:lo + head_dim]            # (S, hd) bf16 ref slices
        k = k_ref[:, lo:lo + head_dim]
        v = v_ref[:, lo:lo + head_dim]
        # NT contraction q @ k^T handled natively by Mosaic on the MXU.
        s = jax.lax.dot_general(q, k, (((1,), (1,)), ((), ())),
                                preferred_element_type=jnp.float32)
        s = s * scale + mask
        s = s - jnp.max(s, axis=-1, keepdims=True)
        p = jnp.exp(s)                            # EUP-bound on v6e/v7x
        denom = jnp.sum(p, axis=-1, keepdims=True)
        ctx = jnp.dot(p.astype(v.dtype), v, preferred_element_type=jnp.float32)
        # Apply 1/denom to the (S, hd) context instead of the (S, S) prob tile.
        ctx = ctx * pl.reciprocal(denom, approx=True)
        o_ref[:, lo:lo + head_dim] = ctx.astype(o_ref.dtype)


def attention(qkv, add_mask, *, batch, seq, heads, head_dim):
    """qkv: [B*S, 3H] fused projection laid out as [Q | K | V].  Returns [B*S, H]."""
    H = heads * head_dim
    M = batch * seq
    scale = 1.0 / math.sqrt(head_dim)
    hb = _pick_head_block(heads, head_dim)

    if hb is not None:
        # Lane-aligned head groups: Q/K/V picked straight out of the fused qkv
        # array via BlockSpec column-block offsets — no wrapper slices in HBM.
        blk = hb * head_dim
        n_groups = heads // hb
        operands = (qkv, qkv, qkv)
        q_map = lambda b, g: (b, g)
        k_map = lambda b, g: (b, n_groups + g)
        v_map = lambda b, g: (b, 2 * n_groups + g)
    else:
        # Tiny / unaligned head widths (smoke test): full-width blocks, wrapper slices.
        hb, blk, n_groups = heads, H, 1
        operands = (qkv[:, :H], qkv[:, H:2 * H], qkv[:, 2 * H:])
        q_map = k_map = v_map = lambda b, g: (b, 0)

    out = pl.pallas_call(
        functools.partial(_attention_kernel, heads=hb, head_dim=head_dim,
                          scale=scale),
        out_shape=jax.ShapeDtypeStruct((M, H), jnp.bfloat16),
        grid=(batch, n_groups),
        in_specs=[pl.BlockSpec((seq, blk), q_map),
                  pl.BlockSpec((seq, blk), k_map),
                  pl.BlockSpec((seq, blk), v_map),
                  pl.BlockSpec((1, 1, seq), lambda b, g: (b, 0, 0))],
        out_specs=pl.BlockSpec((seq, blk), lambda b, g: (b, g)),
        compiler_params=pltpu.CompilerParams(
            dimension_semantics=("parallel", "parallel"),
            vmem_limit_bytes=_VMEM_LIMIT),
    )(*operands, add_mask)
    return out


# -----------------------------------------------------------------------------
# Parameter init (deterministic, synthetic — no checkpoint loading)
# -----------------------------------------------------------------------------
def init_params(key, *, vocab, max_pos, type_vocab, hidden, heads, intermediate,
                layers, num_classes):
    std = 0.02
    keys = iter(jax.random.split(key, 8 + layers * 8))

    def w(shape, dtype=jnp.bfloat16):
        return (jax.random.normal(next(keys), shape, jnp.float32) * std).astype(dtype)

    params = {
        "word_emb": w((vocab, hidden), jnp.float32),
        "pos_emb": w((max_pos, hidden), jnp.float32),
        "type_emb": w((type_vocab, hidden), jnp.float32),
        "emb_ln_g": jnp.ones((hidden,), jnp.float32),
        "emb_ln_b": jnp.zeros((hidden,), jnp.float32),
        "layers": [],
        "pooler_w": w((hidden, hidden)),
        "pooler_b": jnp.zeros((hidden,), jnp.float32),
        "out_w": w((hidden, num_classes)),
        "out_b": jnp.zeros((num_classes,), jnp.float32),
        "config": dict(hidden=hidden, heads=heads, head_dim=hidden // heads),
    }
    for _ in range(layers):
        params["layers"].append({
            "qkv_w": w((hidden, 3 * hidden)),                 # fused Q|K|V
            "qkv_b": jnp.zeros((3 * hidden,), jnp.float32),
            "o_w": w((hidden, hidden)),
            "o_b": jnp.zeros((hidden,), jnp.float32),
            "ln1_g": jnp.ones((hidden,), jnp.float32),
            "ln1_b": jnp.zeros((hidden,), jnp.float32),
            "ff1_w": w((hidden, intermediate)),
            "ff1_b": jnp.zeros((intermediate,), jnp.float32),
            "ff2_w": w((intermediate, hidden)),
            "ff2_b": jnp.zeros((hidden,), jnp.float32),
            "ln2_g": jnp.ones((hidden,), jnp.float32),
            "ln2_b": jnp.zeros((hidden,), jnp.float32),
        })
    return params


# -----------------------------------------------------------------------------
# BertClassifier forward
# -----------------------------------------------------------------------------
def bert_classifier_forward(params, input_ids, attention_mask):
    B, S = input_ids.shape
    cfg = params["config"]
    H, nh, hd = cfg["hidden"], cfg["heads"], cfg["head_dim"]

    # ---- embeddings (gather + adds are glue in plain JAX) ----
    emb = (params["word_emb"][input_ids]
           + params["pos_emb"][:S][None, :, :]
           + params["type_emb"][0][None, None, :])                  # [B, S, H] f32
    x = layer_norm(emb.reshape(B * S, H),
                   params["emb_ln_g"], params["emb_ln_b"])           # [B*S, H] bf16

    # additive attention mask, one copy per batch row only: [B, 1, S]
    add_mask = ((1.0 - attention_mask.astype(jnp.float32)) * -1e9).reshape(B, 1, S)

    for lyr in params["layers"]:
        qkv = linear(x, lyr["qkv_w"], lyr["qkv_b"])                  # [B*S, 3H]
        ctx = attention(qkv, add_mask,
                        batch=B, seq=S, heads=nh, head_dim=hd)       # [B*S, H]
        # attention output projection with fused residual + LayerNorm epilogue
        x = linear_residual_layernorm(ctx, lyr["o_w"], lyr["o_b"],
                                      residual=x,
                                      gamma=lyr["ln1_g"], beta=lyr["ln1_b"])
        ff = linear(x, lyr["ff1_w"], lyr["ff1_b"], activation="gelu")
        # FF2 with fused residual + LayerNorm epilogue
        x = linear_residual_layernorm(ff, lyr["ff2_w"], lyr["ff2_b"],
                                      residual=x,
                                      gamma=lyr["ln2_g"], beta=lyr["ln2_b"])

    # ---- pooler: tanh(W_p @ hidden[CLS]) ----
    sequence_output = x.reshape(B, S, H)
    cls = sequence_output[:, 0, :]                                    # [B, H]
    pooled_output = linear(cls, params["pooler_w"], params["pooler_b"],
                           activation="tanh", out_dtype=jnp.float32)

    # ---- dropout(0.3): identity at inference ----
    # TODO(synk): training-mode stochastic dropout intentionally not replicated.
    dropped = pooled_output

    # ---- classifier head: nn.Linear(hidden, num_classes) (padded to 128 lanes
    #      inside linear() for lane-dense stores, then sliced back) ----
    logits = linear(dropped, params["out_w"], params["out_b"],
                    out_dtype=jnp.float32)                            # [B, num_classes]
    return logits


# -----------------------------------------------------------------------------
if __name__ == "__main__":
    def run(B, S, hidden, heads, inter, layers, vocab, max_pos, num_classes):
        root = jax.random.PRNGKey(0)
        k_param, k_ids = jax.random.split(root)
        params = init_params(
            k_param, vocab=vocab, max_pos=max_pos, type_vocab=2,
            hidden=hidden, heads=heads, intermediate=inter, layers=layers,
            num_classes=num_classes)
        input_ids = jax.random.randint(k_ids, (B, S), 0, vocab, dtype=jnp.int32)
        lengths = jnp.array([S] * (B - 1) + [max(S // 2, 1)], dtype=jnp.int32)
        attention_mask = (jnp.arange(S)[None, :] < lengths[:, None]).astype(jnp.int32)
        logits = bert_classifier_forward(params, input_ids, attention_mask)
        logits = jax.block_until_ready(logits)
        assert logits.shape == (B, num_classes) and logits.dtype == jnp.float32
        assert bool(jnp.all(jnp.isfinite(logits)))

    # Tiny shapes consistent with the module (exercises the unaligned fallbacks).
    run(B=2, S=8, hidden=32, heads=2, inter=64, layers=2,
        vocab=100, max_pos=16, num_classes=3)
    # Lane-aligned shapes: exercises fused-QKV attention blocking, fused
    # matmul+residual+LayerNorm epilogue and divisor-aware matmul tiling.
    run(B=2, S=128, hidden=128, heads=2, inter=512, layers=1,
        vocab=100, max_pos=128, num_classes=3)
    print("KERNEL_OK")
</pallas_src>

<mosaic_0001>
module attributes {stable_mosaic.version = 11 : i64} {
  func.func @_ln_kernel(%arg0: i32, %arg1: memref<16x32xf32, #tpu.memory_space<vmem>>, %arg2: memref<1x32xf32, #tpu.memory_space<vmem>>, %arg3: memref<1x32xf32, #tpu.memory_space<vmem>>, %arg4: memref<16x32xbf16, #tpu.memory_space<vmem>>) attributes {dimension_semantics = [#tpu.dimension_semantics<parallel>], iteration_bounds = array<i64: 1>, scalar_prefetch = 0 : i64, scratch_operands = 0 : i64, tpu.core_type = #tpu.core_type<tc>, window_params = [{transform_indices = @transform_0, window_bounds = array<i64: 16, 32>}, {pipeline_mode = #tpu.pipeline_mode<synchronous>, transform_indices = @transform_1, window_bounds = array<i64: 1, 32>}, {pipeline_mode = #tpu.pipeline_mode<synchronous>, transform_indices = @transform_2, window_bounds = array<i64: 1, 32>}, {transform_indices = @transform_3, window_bounds = array<i64: 16, 32>}]} {
    %c0 = arith.constant 0 : index
    %c0_0 = arith.constant 0 : index
    %0 = vector.load %arg1[%c0, %c0_0] : memref<16x32xf32, #tpu.memory_space<vmem>>, vector<16x32xf32>
    %c0_1 = arith.constant 0 : index
    %c0_2 = arith.constant 0 : index
    %1 = vector.load %arg2[%c0_1, %c0_2] : memref<1x32xf32, #tpu.memory_space<vmem>>, vector<1x32xf32>
    %c0_3 = arith.constant 0 : index
    %c0_4 = arith.constant 0 : index
    %2 = vector.load %arg3[%c0_3, %c0_4] : memref<1x32xf32, #tpu.memory_space<vmem>>, vector<1x32xf32>
    %cst = arith.constant dense<0.000000e+00> : vector<16xf32>
    %3 = vector.multi_reduction <add>, %0, %cst [1] : vector<16x32xf32> to vector<16xf32>
    %4 = vector.shape_cast %3 : vector<16xf32> to vector<16x1xf32>
    %cst_5 = arith.constant 3.200000e+01 : f32
    %5 = vector.broadcast %cst_5 : f32 to vector<16x1xf32>
    %6 = arith.divf %4, %5 : vector<16x1xf32>
    %7 = arith.mulf %0, %0 : vector<16x32xf32>
    %cst_6 = arith.constant dense<0.000000e+00> : vector<16xf32>
    %8 = vector.multi_reduction <add>, %7, %cst_6 [1] : vector<16x32xf32> to vector<16xf32>
    %9 = vector.shape_cast %8 : vector<16xf32> to vector<16x1xf32>
    %cst_7 = arith.constant 3.200000e+01 : f32
    %10 = vector.broadcast %cst_7 : f32 to vector<16x1xf32>
    %11 = arith.divf %9, %10 : vector<16x1xf32>
    %12 = arith.mulf %6, %6 : vector<16x1xf32>
    %13 = arith.subf %11, %12 : vector<16x1xf32>
    %cst_8 = arith.constant 0.000000e+00 : f32
    %14 = vector.broadcast %cst_8 : f32 to vector<16x1xf32>
    %15 = arith.maximumf %13, %14 : vector<16x1xf32>
    %16 = vector.broadcast %6 : vector<16x1xf32> to vector<16x32xf32>
    %17 = arith.subf %0, %16 : vector<16x32xf32>
    %cst_9 = arith.constant 9.99999996E-13 : f32
    %18 = vector.broadcast %cst_9 : f32 to vector<16x1xf32>
    %19 = arith.addf %15, %18 : vector<16x1xf32>
    %20 = math.rsqrt %19 : vector<16x1xf32>
    %21 = vector.broadcast %20 : vector<16x1xf32> to vector<16x32xf32>
    %22 = arith.mulf %17, %21 : vector<16x32xf32>
    %23 = vector.broadcast %1 : vector<1x32xf32> to vector<16x32xf32>
    %24 = arith.mulf %22, %23 : vector<16x32xf32>
    %25 = vector.broadcast %2 : vector<1x32xf32> to vector<16x32xf32>
    %26 = arith.addf %24, %25 : vector<16x32xf32>
    %27 = arith.truncf %26 : vector<16x32xf32> to vector<16x32xbf16>
    %c0_10 = arith.constant 0 : index
    %c0_11 = arith.constant 0 : index
    %28 = vector.load %arg4[%c0_10, %c0_11] : memref<16x32xbf16, #tpu.memory_space<vmem>>, vector<16x32xbf16>
    tpu.vector_store %arg4[%c0_10, %c0_11], %27 {strides = array<i32>} : memref<16x32xbf16, #tpu.memory_space<vmem>>, vector<16x32xbf16>,
    return
  }
  func.func @transform_0(%arg0: i32) -> (i32, i32) {
    %c0_i32 = arith.constant 0 : i32
    %c0_i32_0 = arith.constant 0 : i32
    return %arg0, %c0_i32 : i32, i32
  }
  func.func @transform_1(%arg0: i32) -> (i32, i32) {
    %c0_i32 = arith.constant 0 : i32
    %c0_i32_0 = arith.constant 0 : i32
    %c0_i32_1 = arith.constant 0 : i32
    return %c0_i32, %c0_i32_0 : i32, i32
  }
  func.func @transform_2(%arg0: i32) -> (i32, i32) {
    %c0_i32 = arith.constant 0 : i32
    %c0_i32_0 = arith.constant 0 : i32
    %c0_i32_1 = arith.constant 0 : i32
    return %c0_i32, %c0_i32_0 : i32, i32
  }
  func.func @transform_3(%arg0: i32) -> (i32, i32) {
    %c0_i32 = arith.constant 0 : i32
    %c0_i32_0 = arith.constant 0 : i32
    return %arg0, %c0_i32 : i32, i32
  }
}

</mosaic_0001>

<bundles_post_ra>
// kernel: tpu_custom_call.1
= control target key start
LH: loop header
LB: loop body
LE: loop exit
PB: predicated region body
PF: predicated region fallthrough
CT: control target
= control target key end

     0   :  { %8 = vsyncpa [#allocation3], 0  ;;  %s231_s0 = inlined_call_operand.hbm [shape: f32[16,32], index: 0, kind: input, shape index: {}]   ;;  %s232_s1 = inlined_call_operand.vmem [shape: f32[1,32], index: 1, kind: input, shape index: {}]   ;;  %s233_s2 = inlined_call_operand.vmem [shape: f32[1,32], index: 2, kind: input, shape index: {}]   ;;  %s234_s3 = inlined_call_operand.hbm [shape: bf16[16,32], index: 3, kind: output, shape index: {}]  }
   0x1   :  { %9 = vsyncpa [#allocation4], 0  ;;  %s175_s12 = smov [#allocation2]   ;;  %s127_s16 = scalar_lea.hbm %s231_s0, 256 }
   0x2   :  { %s15_s13 = sshll.u32 %s175_s12, 4  ;;  %p128_p0 = scmp.ne.s32.totalorder %s231_s0, %s127_s16  ;;  %s16_s13 = int_to_ptr.vmem [resolvable:$true] %s15_s13 }
   0x3   :  { %p131_p1 = scmp.lt.u32.totalorder %s127_s16, %s231_s0 }
   0x5   :  { %p133_p2 = pnand %p131_p1, %p128_p0 }
   0x7   :  { %136 = shalt.err (!%p133_p2)
}
   0x8   :  { %s137_s21 = scalar_lea.vmem %s16_s13, 256  ;;  %p142_p4 = scmp.lt.s32.totalorder %s16_s13, %s16_s13 }
   0x9   :  { %p138_p3 = scmp.ne.s32.totalorder %s16_s13, %s137_s21  ;;  %p143_p5 = scmp.lt.s32.totalorder %s137_s21, %s137_s21 }
   0xb   :  { %p144_p6 = por %p143_p5, %p142_p4 }
   0xd   :  { %p145_p7 = pnand %p144_p6, %p138_p3 }
   0xf   :  { %148 = shalt.err (!%p145_p7)
}
  0x10   :  { %s176_s22 = smov 128   ;;  %s177_s23 = smov 8  }
  0x11   :  { %21 = dma.hbm_to_vmem [thread:$0]  %s231_s0, 256, %s16_s13, [#allocation3], %s176_s22, %s176_s22, %s177_s23  }
  0x12   :  { %171 = dma.done.wait [#allocation3], 256  }
  0x13   :  { %172 = vsyncadd [#allocation3], 4294967040  ;;  %vm33_vm0 = vcmask 261120   ;;  %v29_v0 = vld [vmem:[#allocation2] sm:$0xff]  ;;  %v30_v1 = vld [vmem:[#allocation2 + $0x8] sm:$0xff]  ;;  %vm91_vm1 = vcmask 257024  }
  0x14   :  { %v34_v2 = vsel %vm33_vm0, %v29_v0, 0.0  ;;  %v43_v3 = vmul.f32 %v29_v0, %v29_v0  ;;  %v44_v4 = vmul.f32 %v30_v1, %v30_v1  ;;  %v37_v6 = vsel %vm33_vm0, %v30_v1, 0.0  ;;  %v111_v26 = vld [vmem:[%s232_s1] ss:$0 sm:$0xff]  ;;  %s178_s29 = smov [#allocation5]  }
  0x15   :  { %35 = vadd.xlane.f32.xlu0 %v34_v2  ;;  %v112_v28 = vld [vmem:[%s233_s2] ss:$0 sm:$0xff]  ;;  %s99_s30 = sshll.u32 %s178_s29, 4  ;;  %s100_s30 = int_to_ptr.vmem [resolvable:$true] %s99_s30 }
  0x16   :  { %v45_v5 = vsel %vm33_vm0, %v43_v3, 0.0  ;;  %v48_v7 = vsel %vm33_vm0, %v44_v4, 0.0  ;;  %s149_s1 = scalar_lea.vmem %s100_s30, 128  ;;  %p154_p9 = scmp.lt.s32.totalorder %s100_s30, %s100_s30 }
  0x17   :  { %46 = vadd.xlane.f32.xlu1 %v45_v5  ;;  %p150_p8 = scmp.ne.s32.totalorder %s100_s30, %s149_s1  ;;  %p155_p10 = scmp.lt.s32.totalorder %s149_s1, %s149_s1 }
  0x19   :  { %38 = vadd.xlane.f32.xlu0 %v37_v6  ;;  %p156_p11 = por %p155_p10, %p154_p9 }
  0x1b   :  { %49 = vadd.xlane.f32.xlu1 %v48_v7  ;;  %p157_p12 = pnand %p156_p11, %p150_p8 }
  0xa2   :  { %v36_v8 = vpop.xlane.xlu0 %35 }
  0xa3   :  { %v41_v9 = vmul.f32 0.03125, %v36_v8 }
  0xa4   :  { %v47_v10 = vpop.xlane.xlu1 %46 }
  0xa5   :  { %v53_v11 = vmul.f32 %v41_v9, %v41_v9  ;;  %v51_v12 = vmul.f32 0.03125, %v47_v10  ;;  %v59_v24 = vsub.f32 %v29_v0, %v41_v9 }
  0xa6   :  { %v39_v13 = vpop.xlane.xlu0 %38 }
  0xa7   :  { %v55_v14 = vsub.f32 %v51_v12, %v53_v11  ;;  %v42_v15 = vmul.f32 0.03125, %v39_v13 }
  0xa8   :  { %v50_v16 = vpop.xlane.xlu1 %49 }
  0xa9   :  { %v57_v17 = vmax.f32 %v55_v14, 0.0  ;;  %v54_v18 = vmul.f32 %v42_v15, %v42_v15  ;;  %v52_v19 = vmul.f32 0.03125, %v50_v16  ;;  %v60_v29 = vsub.f32 %v30_v1, %v42_v15 }
  0xab   :  { %v61_v20 = vadd.f32 1e-12, %v57_v17  ;;  %v56_v21 = vsub.f32 %v52_v19, %v54_v18 }
  0xad   :  { %123 = vrsqrt.f32 %v61_v20  ;;  %v58_v22 = vmax.f32 %v56_v21, 0.0 }
  0xaf   :  { %v62_v23 = vadd.f32 1e-12, %v58_v22 }
  0xb1   :  { %125 = vrsqrt.f32 %v62_v23 }
  0xb7   :  { %v124_v25 = vpop.eup %123 }
  0xb8   :  { %v65_v27 = vmul.f32 %v124_v25, %v59_v24 }
  0xba   :  { %v73_v30 = vmul.f32 %v111_v26, %v65_v27 }
  0xbb   :  { %v126_v31 = vpop.eup %125 }
  0xbc   :  { %v66_v32 = vmul.f32 %v126_v31, %v60_v29  ;;  %v81_v33 = vadd.f32 %v112_v28, %v73_v30 }
  0xbe   :  { %v74_v34 = vmul.f32 %v111_v26, %v66_v32  ;;  %v115_v35 = vpack.c.bf16 %v81_v33, %v81_v33 }
  0xc0   :  { %v82_v36 = vadd.f32 %v112_v28, %v74_v34  ;;  %92 = vst.msk [vmem:[#allocation5] sm:$0xf] %vm91_vm1, %v115_v35 }
  0xc2   :  { %v116_v37 = vpack.c.bf16 %v82_v36, %v82_v36 }
  0xc4   :  { %93 = vst.msk [vmem:[#allocation5 + $0x4] sm:$0xf] %vm91_vm1, %v116_v37 }
  0xc5   :  { %160 = shalt.err (!%p157_p12)
}
  0xc6   :  { %s161_s5 = scalar_lea.hbm %s234_s3, 128 }
  0xc7   :  { %p162_p13 = scmp.ne.s32.totalorder %s234_s3, %s161_s5  ;;  %p165_p0 = scmp.lt.u32.totalorder %s161_s5, %s234_s3 }
  0xc9   :  { %p167_p1 = pnand %p165_p0, %p162_p13 }
  0xcb   :  { %170 = shalt.err (!%p167_p1)
}
  0xcc   :  { %s179_s10 = smov 64   ;;  %s180_s11 = smov 4  }
  0xcd   :  { %105 = dma.vmem_to_hbm [thread:$0]  %s100_s30, 128, %s234_s3, [#allocation4], %s179_s10, %s179_s10, %s180_s11  }
  0xce   :  { %173 = dma.done.wait [#allocation4], 128  }
  0xcf   :  { %174 = vsyncadd [#allocation4], 4294967168 }
  0xd0   :  { %109 = vsyncpa [#allocation3], 1 }
  0xd1   :  { %110 = vsyncpa [#allocation4], 1 }

</bundles_post_ra>
